<compile_context>
chip_gen: v6e
topology: v6e:2x2x1
jax: 0.10.0
libtpu: 0.0.40
codegen_flags: <defaults>
</compile_context>

<pallas_src>
import functools

import jax
import jax.numpy as jnp
from jax.experimental import pallas as pl
from jax.experimental.pallas import tpu as pltpu


# ---- static model dims (NeuralMnist: 784 -> 350 -> 50 -> 10) ----
IN_DIM, H1, H2, N_CLASSES = 28 * 28, 350, 50, 10


def _ceil_to(x, m):
    return (x + m - 1) // m * m


# Lane-padded hidden/output dims (multiples of 128) for dense MXU columns / unmasked stores.
# The contraction dim of fc1 (784) is deliberately left unpadded.
H1_PAD = _ceil_to(H1, 128)           # 384
H2_PAD = _ceil_to(H2, 128)           # 128
OUT_PAD = _ceil_to(N_CLASSES, 128)   # 128

_NEG_INF = -1e30  # baked into padded fc3 bias lanes so they vanish in the logsumexp


def _mnist_mlp_kernel(x_ref, w1_ref, b1_ref, w2_ref, b2_ref, w3_ref, b3_ref, o_ref):
    """One batch tile of the MLP forward, entirely in VMEM.

    x_ref:  [TB, 784] f32 (cast to bf16 in-kernel for the MXU)
    w*_ref: bf16 [in(_pad), out_pad], b*_ref: f32 [1, out_pad]
            (b3 has -1e30 on lanes >= N_CLASSES, which masks the padded class lanes)
    o_ref:  [TB, OUT_PAD] f32 log-probs; only the first N_CLASSES lanes are valid.
    """
    # fc1 + ReLU: bf16 operands into the MXU, f32 accumulation, f32 bias/ReLU on the VPU.
    x = x_ref[...].astype(jnp.bfloat16)                                     # [TB, 784]
    h = jnp.dot(x, w1_ref[...], preferred_element_type=jnp.float32)
    h = jnp.maximum(h + b1_ref[...], 0.0)                                   # [TB, H1_PAD]

    # fc2 + ReLU
    h = jnp.dot(h.astype(jnp.bfloat16), w2_ref[...], preferred_element_type=jnp.float32)
    h = jnp.maximum(h + b2_ref[...], 0.0)                                   # [TB, H2_PAD]

    # fc3 (logits); padded class lanes become ~-1e30 via the pre-masked bias.
    logits = jnp.dot(h.astype(jnp.bfloat16), w3_ref[...], preferred_element_type=jnp.float32)
    logits = logits + b3_ref[...]                                           # [TB, OUT_PAD]

    # log_softmax; padded lanes carry -1e30 logits -> exp underflows to exactly 0.
    m = jnp.max(logits, axis=-1, keepdims=True)
    lse = m + jnp.log(jnp.sum(jnp.exp(logits - m), axis=-1, keepdims=True))
    o_ref[...] = logits - lse


def _choose_tile(b, max_tile):
    """Adaptive batch tile.

    - multiple of 16 rows (bf16 sublane packing minimum), capped at `max_tile`
    - for small batches the tile shrinks so padding waste is <= 1 tile
    - a single large tile (> 256 rows) is split in two so v7x's 2 TensorCores both get work
    """
    bp = _ceil_to(b, 16)
    if bp <= max_tile:
        tile = _ceil_to((bp + 1) // 2, 16) if bp > 256 else bp
    else:
        tile = max_tile
    return max(tile, 16)


@functools.partial(jax.jit, static_argnames=("block_b",))
def neural_mnist_forward(x, params, *, block_b=512):
    """x: [B, ...] with prod(...) == 784 (e.g. [B, 1, 28, 28]); params = (w1, b1, w2, b2,
    w3, b3), weights stored [in, out] (i.e. torch W^T), all float32, unpadded."""
    w1, b1, w2, b2, w3, b3 = params
    b = x.shape[0]
    xf = x.reshape(b, -1).astype(jnp.float32)              # nn.Flatten (no copy for contiguous x)
    assert xf.shape[1] == IN_DIM

    # Adaptive batch tiling; pad the batch (only) up to a tile multiple.
    tile = _choose_tile(b, block_b)
    bp = _ceil_to(b, tile)
    if bp != b:
        xf = jnp.pad(xf, ((0, bp - b), (0, 0)))

    # Weights: bf16, feature dims zero-padded to lane multiples (fc1's K=784 left unpadded).
    def pad_w(w, r, c):
        return jnp.zeros((r, c), jnp.bfloat16).at[:w.shape[0], :w.shape[1]].set(
            w.astype(jnp.bfloat16))

    def pad_b(v, c):
        return jnp.zeros((1, c), jnp.float32).at[0, :v.shape[0]].set(v.astype(jnp.float32))

    w1p = pad_w(w1, IN_DIM, H1_PAD)
    w2p = pad_w(w2, H1_PAD, H2_PAD)
    w3p = pad_w(w3, H2_PAD, OUT_PAD)
    b1p, b2p = pad_b(b1, H1_PAD), pad_b(b2, H2_PAD)
    # Pre-bake the class-lane mask into the fc3 bias: padded lanes get -1e30 logits.
    b3p = jnp.full((1, OUT_PAD), _NEG_INF, jnp.float32).at[0, :N_CLASSES].set(
        b3.astype(jnp.float32))

    grid = (bp // tile,)

    # Explicit VMEM budget: double-buffered streamed x/out tiles + (double-buffered) resident
    # bf16 weights + in-kernel f32/bf16 intermediates + headroom.
    tile_io_bytes = tile * IN_DIM * 4 + tile * OUT_PAD * 4
    weight_bytes = (IN_DIM * H1_PAD + H1_PAD * H2_PAD + H2_PAD * OUT_PAD) * 2 \
                   + (H1_PAD + H2_PAD + OUT_PAD) * 4
    interm_bytes = tile * (IN_DIM * 2 + H1_PAD * 6 + H2_PAD * 6 + OUT_PAD * 12)
    vmem_limit = min(2 * tile_io_bytes + 2 * weight_bytes + interm_bytes + (8 << 20), 48 << 20)

    out = pl.pallas_call(
        _mnist_mlp_kernel,
        out_shape=jax.ShapeDtypeStruct((bp, OUT_PAD), jnp.float32),
        grid_spec=pltpu.PrefetchScalarGridSpec(
            num_scalar_prefetch=0,
            grid=grid,
            in_specs=[
                pl.BlockSpec((tile, IN_DIM), lambda i: (i, 0)),      # x tiles stream per step
                pl.BlockSpec((IN_DIM, H1_PAD), lambda i: (0, 0)),    # weights/biases resident
                pl.BlockSpec((1, H1_PAD), lambda i: (0, 0)),
                pl.BlockSpec((H1_PAD, H2_PAD), lambda i: (0, 0)),
                pl.BlockSpec((1, H2_PAD), lambda i: (0, 0)),
                pl.BlockSpec((H2_PAD, OUT_PAD), lambda i: (0, 0)),
                pl.BlockSpec((1, OUT_PAD), lambda i: (0, 0)),
            ],
            out_specs=pl.BlockSpec((tile, OUT_PAD), lambda i: (i, 0)),
        ),
        compiler_params=pltpu.CompilerParams(
            dimension_semantics=("parallel",),     # batch tiles shard across v7x's 2 TCs
            vmem_limit_bytes=int(vmem_limit),
        ),
    )(xf, w1p, b1p, w2p, b2p, w3p, b3p)

    return out[:b, :N_CLASSES]


def init_params(key):
    """Mirror torch.nn.Linear default init; weights stored [in, out] (torch W^T)."""
    ks = jax.random.split(key, 6)

    def lin(kw, kb, fan_in, fan_out):
        bound = 1.0 / jnp.sqrt(jnp.float32(fan_in))
        w = jax.random.uniform(kw, (fan_in, fan_out), jnp.float32, -bound, bound)
        b = jax.random.uniform(kb, (fan_out,), jnp.float32, -bound, bound)
        return w, b

    w1, b1 = lin(ks[0], ks[1], IN_DIM, H1)
    w2, b2 = lin(ks[2], ks[3], H1, H2)
    w3, b3 = lin(ks[4], ks[5], H2, N_CLASSES)
    return (w1, b1, w2, b2, w3, b3)


def _reference(x, params):
    """Pure-JAX reference mirroring the kernel's bf16-operand / f32-accumulate matmuls."""
    w1, b1, w2, b2, w3, b3 = params
    xf = x.reshape(x.shape[0], -1).astype(jnp.float32)

    def mm(a, w):
        return jnp.dot(a.astype(jnp.bfloat16), w.astype(jnp.bfloat16),
                       preferred_element_type=jnp.float32)

    h = jnp.maximum(mm(xf, w1) + b1, 0.0)
    h = jnp.maximum(mm(h, w2) + b2, 0.0)
    logits = mm(h, w3) + b3
    return jax.nn.log_softmax(logits, axis=-1)


if __name__ == "__main__":
    B = 16  # small demo batch; the adaptive tiling shrinks the batch tile to match
    key = jax.random.PRNGKey(0)
    k_x, k_p = jax.random.split(key)

    x = jax.random.normal(k_x, (B, 1, 28, 28), jnp.float32)
    params = init_params(k_p)

    out = neural_mnist_forward(x, params)          # default block_b=512, adapts to 16 rows here
    out = jax.block_until_ready(out)

    ref = _reference(x, params)
    assert out.shape == (B, N_CLASSES)
    assert jnp.allclose(out, ref, atol=2e-3, rtol=2e-3), "mismatch vs pure-JAX reference"
    # log_softmax rows must exponentiate to a valid distribution
    assert jnp.allclose(jnp.sum(jnp.exp(out), axis=-1), 1.0, atol=1e-3)

    print("KERNEL_OK")
</pallas_src>

<mosaic_0001>
module attributes {stable_mosaic.version = 11 : i64} {
  func.func @_mnist_mlp_kernel(%arg0: i32, %arg1: memref<16x784xf32, #tpu.memory_space<vmem>>, %arg2: memref<784x384xbf16, #tpu.memory_space<vmem>>, %arg3: memref<1x384xf32, #tpu.memory_space<vmem>>, %arg4: memref<384x128xbf16, #tpu.memory_space<vmem>>, %arg5: memref<1x128xf32, #tpu.memory_space<vmem>>, %arg6: memref<128x128xbf16, #tpu.memory_space<vmem>>, %arg7: memref<1x128xf32, #tpu.memory_space<vmem>>, %arg8: memref<16x128xf32, #tpu.memory_space<vmem>>) attributes {dimension_semantics = [#tpu.dimension_semantics<parallel>], iteration_bounds = array<i64: 1>, scalar_prefetch = 0 : i64, scratch_operands = 0 : i64, tpu.core_type = #tpu.core_type<tc>, window_params = [{transform_indices = @transform_0, window_bounds = array<i64: 16, 784>}, {pipeline_mode = #tpu.pipeline_mode<synchronous>, transform_indices = @transform_1, window_bounds = array<i64: 784, 384>}, {pipeline_mode = #tpu.pipeline_mode<synchronous>, transform_indices = @transform_2, window_bounds = array<i64: 1, 384>}, {pipeline_mode = #tpu.pipeline_mode<synchronous>, transform_indices = @transform_3, window_bounds = array<i64: 384, 128>}, {pipeline_mode = #tpu.pipeline_mode<synchronous>, transform_indices = @transform_4, window_bounds = array<i64: 1, 128>}, {pipeline_mode = #tpu.pipeline_mode<synchronous>, transform_indices = @transform_5, window_bounds = array<i64: 128, 128>}, {pipeline_mode = #tpu.pipeline_mode<synchronous>, transform_indices = @transform_6, window_bounds = array<i64: 1, 128>}, {transform_indices = @transform_7, window_bounds = array<i64: 16, 128>}]} {
    %c0 = arith.constant 0 : index
    %c0_0 = arith.constant 0 : index
    %0 = vector.load %arg1[%c0, %c0_0] : memref<16x784xf32, #tpu.memory_space<vmem>>, vector<16x784xf32>
    %1 = arith.truncf %0 : vector<16x784xf32> to vector<16x784xbf16>
    %c0_1 = arith.constant 0 : index
    %c0_2 = arith.constant 0 : index
    %2 = vector.load %arg2[%c0_1, %c0_2] : memref<784x384xbf16, #tpu.memory_space<vmem>>, vector<784x384xbf16>
    %cst = arith.constant dense<0.000000e+00> : vector<16x384xf32>
    %3 = tpu.matmul %1, %2, %cst {dimension_numbers = #tpu.dot_dimension_numbers<[1], [0], [0], [1], [0, 0, 1, 1], [], []>} : vector<16x784xbf16>, vector<784x384xbf16>, vector<16x384xf32> -> vector<16x384xf32>
    %c0_3 = arith.constant 0 : index
    %c0_4 = arith.constant 0 : index
    %4 = vector.load %arg3[%c0_3, %c0_4] : memref<1x384xf32, #tpu.memory_space<vmem>>, vector<1x384xf32>
    %5 = vector.broadcast %4 : vector<1x384xf32> to vector<16x384xf32>
    %6 = arith.addf %3, %5 : vector<16x384xf32>
    %cst_5 = arith.constant 0.000000e+00 : f32
    %7 = vector.broadcast %cst_5 : f32 to vector<16x384xf32>
    %8 = arith.maximumf %6, %7 : vector<16x384xf32>
    %9 = arith.truncf %8 : vector<16x384xf32> to vector<16x384xbf16>
    %c0_6 = arith.constant 0 : index
    %c0_7 = arith.constant 0 : index
    %10 = vector.load %arg4[%c0_6, %c0_7] : memref<384x128xbf16, #tpu.memory_space<vmem>>, vector<384x128xbf16>
    %cst_8 = arith.constant dense<0.000000e+00> : vector<16x128xf32>
    %11 = tpu.matmul %9, %10, %cst_8 {dimension_numbers = #tpu.dot_dimension_numbers<[1], [0], [0], [1], [0, 0, 1, 1], [], []>} : vector<16x384xbf16>, vector<384x128xbf16>, vector<16x128xf32> -> vector<16x128xf32>
    %c0_9 = arith.constant 0 : index
    %c0_10 = arith.constant 0 : index
    %12 = vector.load %arg5[%c0_9, %c0_10] : memref<1x128xf32, #tpu.memory_space<vmem>>, vector<1x128xf32>
    %13 = vector.broadcast %12 : vector<1x128xf32> to vector<16x128xf32>
    %14 = arith.addf %11, %13 : vector<16x128xf32>
    %cst_11 = arith.constant 0.000000e+00 : f32
    %15 = vector.broadcast %cst_11 : f32 to vector<16x128xf32>
    %16 = arith.maximumf %14, %15 : vector<16x128xf32>
    %17 = arith.truncf %16 : vector<16x128xf32> to vector<16x128xbf16>
    %c0_12 = arith.constant 0 : index
    %c0_13 = arith.constant 0 : index
    %18 = vector.load %arg6[%c0_12, %c0_13] : memref<128x128xbf16, #tpu.memory_space<vmem>>, vector<128x128xbf16>
    %cst_14 = arith.constant dense<0.000000e+00> : vector<16x128xf32>
    %19 = tpu.matmul %17, %18, %cst_14 {dimension_numbers = #tpu.dot_dimension_numbers<[1], [0], [0], [1], [0, 0, 1, 1], [], []>} : vector<16x128xbf16>, vector<128x128xbf16>, vector<16x128xf32> -> vector<16x128xf32>
    %c0_15 = arith.constant 0 : index
    %c0_16 = arith.constant 0 : index
    %20 = vector.load %arg7[%c0_15, %c0_16] : memref<1x128xf32, #tpu.memory_space<vmem>>, vector<1x128xf32>
    %21 = vector.broadcast %20 : vector<1x128xf32> to vector<16x128xf32>
    %22 = arith.addf %19, %21 : vector<16x128xf32>
    %cst_17 = arith.constant dense<0xFF800000> : vector<16xf32>
    %23 = vector.multi_reduction <maximumf>, %22, %cst_17 [1] : vector<16x128xf32> to vector<16xf32>
    %24 = vector.shape_cast %23 : vector<16xf32> to vector<16x1xf32>
    %25 = vector.broadcast %24 : vector<16x1xf32> to vector<16x128xf32>
    %26 = arith.subf %22, %25 : vector<16x128xf32>
    %27 = math.exp %26 : vector<16x128xf32>
    %cst_18 = arith.constant dense<0.000000e+00> : vector<16xf32>
    %28 = vector.multi_reduction <add>, %27, %cst_18 [1] : vector<16x128xf32> to vector<16xf32>
    %29 = vector.shape_cast %28 : vector<16xf32> to vector<16x1xf32>
    %30 = math.log %29 : vector<16x1xf32>
    %31 = arith.addf %24, %30 : vector<16x1xf32>
    %32 = vector.broadcast %31 : vector<16x1xf32> to vector<16x128xf32>
    %33 = arith.subf %22, %32 : vector<16x128xf32>
    %c0_19 = arith.constant 0 : index
    %c0_20 = arith.constant 0 : index
    %34 = vector.load %arg8[%c0_19, %c0_20] : memref<16x128xf32, #tpu.memory_space<vmem>>, vector<16x128xf32>
    tpu.vector_store %arg8[%c0_19, %c0_20], %33 {strides = array<i32>} : memref<16x128xf32, #tpu.memory_space<vmem>>, vector<16x128xf32>,
    return
  }
  func.func @transform_0(%arg0: i32) -> (i32, i32) {
    %c0_i32 = arith.constant 0 : i32
    %c0_i32_0 = arith.constant 0 : i32
    return %arg0, %c0_i32 : i32, i32
  }
  func.func @transform_1(%arg0: i32) -> (i32, i32) {
    %c0_i32 = arith.constant 0 : i32
    %c0_i32_0 = arith.constant 0 : i32
    %c0_i32_1 = arith.constant 0 : i32
    return %c0_i32, %c0_i32_0 : i32, i32
  }
  func.func @transform_2(%arg0: i32) -> (i32, i32) {
    %c0_i32 = arith.constant 0 : i32
    %c0_i32_0 = arith.constant 0 : i32
    %c0_i32_1 = arith.constant 0 : i32
    return %c0_i32, %c0_i32_0 : i32, i32
  }
  func.func @transform_3(%arg0: i32) -> (i32, i32) {
    %c0_i32 = arith.constant 0 : i32
    %c0_i32_0 = arith.constant 0 : i32
    %c0_i32_1 = arith.constant 0 : i32
    return %c0_i32, %c0_i32_0 : i32, i32
  }
  func.func @transform_4(%arg0: i32) -> (i32, i32) {
    %c0_i32 = arith.constant 0 : i32
    %c0_i32_0 = arith.constant 0 : i32
    %c0_i32_1 = arith.constant 0 : i32
    return %c0_i32, %c0_i32_0 : i32, i32
  }
  func.func @transform_5(%arg0: i32) -> (i32, i32) {
    %c0_i32 = arith.constant 0 : i32
    %c0_i32_0 = arith.constant 0 : i32
    %c0_i32_1 = arith.constant 0 : i32
    return %c0_i32, %c0_i32_0 : i32, i32
  }
  func.func @transform_6(%arg0: i32) -> (i32, i32) {
    %c0_i32 = arith.constant 0 : i32
    %c0_i32_0 = arith.constant 0 : i32
    %c0_i32_1 = arith.constant 0 : i32
    return %c0_i32, %c0_i32_0 : i32, i32
  }
  func.func @transform_7(%arg0: i32) -> (i32, i32) {
    %c0_i32 = arith.constant 0 : i32
    %c0_i32_0 = arith.constant 0 : i32
    return %arg0, %c0_i32 : i32, i32
  }
}

</mosaic_0001>

<bundles_post_ra>
// kernel: neural_mnist_forward.1
= control target key start
LH: loop header
LB: loop body
LE: loop exit
PB: predicated region body
PF: predicated region fallthrough
CT: control target
= control target key end

     0   :  { %vm1046_vm0 = vcmask 130048   ;;  %vm2434_vm1 = vmmov 0   ;;  %s3118_s0 = inlined_call_operand.vmem [shape: f32[16,784], index: 0, kind: input, shape index: {}]   ;;  %s3119_s1 = inlined_call_operand.vmem [shape: bf16[784,384], index: 1, kind: input, shape index: {}]   ;;  %s3120_s2 = inlined_call_operand.vmem [shape: f32[1,384], index: 2, kind: input, shape index: {}]   ;;  %s3121_s3 = inlined_call_operand.vmem [shape: bf16[384,128], index: 3, kind: input, shape index: {}]   ;;  %s3122_s4 = inlined_call_operand.vmem [shape: f32[1,128], index: 4, kind: input, shape index: {}]   ;;  %s3123_s5 = inlined_call_operand.vmem [shape: bf16[128,128], index: 5, kind: input, shape index: {}]   ;;  %s3124_s6 = inlined_call_operand.vmem [shape: f32[1,128], index: 6, kind: input, shape index: {}]   ;;  %s3125_s7 = inlined_call_operand.hbm [shape: f32[16,128], index: 7, kind: output, shape index: {}]  }
   0x1   :  { %v2174_v0 = vld [vmem:[%s3119_s1 + $0xac] ss:$12 sps:$4 sm:$0xff]   ;;  %v2176_v1 = vld [vmem:[%s3119_s1 + $0xa8] ss:$12 sps:$4 sm:$0xff]   ;;  %v2182_v5 = vld [vmem:[%s3119_s1 + $0x90] ss:$12 sps:$4 sm:$0xff]  }
   0x2   :  { %1050 = vmatprep.subr.bf16.mxu0 %v2174_v0  ;;  %v2177_v2 = vld [vmem:[%s3119_s1 + $0x22c] ss:$12 sps:$4 sm:$0xff]   ;;  %v2179_v3 = vld [vmem:[%s3119_s1 + $0x228] ss:$12 sps:$4 sm:$0xff]   ;;  %v2185_v7 = vld [vmem:[%s3119_s1 + $0x210] ss:$12 sps:$4 sm:$0xff]  }
   0x3   :  { %1051 = vmatpush1.bf16.msra.mxu0 %v2176_v1  ;;  %v2180_v4 = vld [vmem:[%s3119_s1 + $0x94] ss:$12 sps:$4 sm:$0xff]   ;;  %1093 = vmatprep.subr.bf16.mxu1 %v2177_v2  ;;  %v2186_v8 = vld [vmem:[%s3119_s1 + $0x7c] ss:$12 sps:$4 sm:$0xff]   ;;  %v2188_v9 = vld [vmem:[%s3119_s1 + $0x78] ss:$12 sps:$4 sm:$0xff]  }
   0x4   :  { %v2183_v6 = vld [vmem:[%s3119_s1 + $0x214] ss:$12 sps:$4 sm:$0xff]   ;;  %1094 = vmatpush1.bf16.msra.mxu1 %v2179_v3  ;;  %1052 = vmatprep.subr.bf16.mxu0 %v2180_v4  ;;  %v2189_v10 = vld [vmem:[%s3119_s1 + $0x1fc] ss:$12 sps:$4 sm:$0xff]   ;;  %v2192_v11 = vld [vmem:[%s3119_s1 + $0x64] ss:$12 sps:$4 sm:$0xff]  }
   0x5   :  { %1095 = vmatprep.subr.bf16.mxu1 %v2183_v6  ;;  %v2191_v12 = vld [vmem:[%s3119_s1 + $0x1f8] ss:$12 sps:$4 sm:$0xff]   ;;  %v2194_v14 = vld [vmem:[%s3119_s1 + $0x60] ss:$12 sps:$4 sm:$0xff]   ;;  %v2200_v18 = vld [vmem:[%s3119_s1 + $0x48] ss:$12 sps:$4 sm:$0xff]  }
   0x6   :  { %v2195_v13 = vld [vmem:[%s3119_s1 + $0x1e4] ss:$12 sps:$4 sm:$0xff]   ;;  %v2198_v15 = vld [vmem:[%s3119_s1 + $0x4c] ss:$12 sps:$4 sm:$0xff]   ;;  %v2204_v19 = vld [vmem:[%s3119_s1 + $0x34] ss:$12 sps:$4 sm:$0xff]  }
   0x7   :  { %1053 = vmatpush1.bf16.msra.mxu0 %v2182_v5  ;;  %v2197_v16 = vld [vmem:[%s3119_s1 + $0x1e0] ss:$12 sps:$4 sm:$0xff]   ;;  %v2203_v20 = vld [vmem:[%s3119_s1 + $0x1c8] ss:$12 sps:$4 sm:$0xff]   ;;  %v2206_v22 = vld [vmem:[%s3119_s1 + $0x30] ss:$12 sps:$4 sm:$0xff]  }
   0x8   :  { %1054 = vmatprep.subr.bf16.mxu0 %v2186_v8  ;;  %1096 = vmatpush1.bf16.msra.mxu1 %v2185_v7  ;;  %v2201_v17 = vld [vmem:[%s3119_s1 + $0x1cc] ss:$12 sps:$4 sm:$0xff]   ;;  %v2207_v21 = vld [vmem:[%s3119_s1 + $0x1b4] ss:$12 sps:$4 sm:$0xff]   ;;  %v2210_v23 = vld [vmem:[%s3119_s1 + $0x1c] ss:$12 sps:$4 sm:$0xff]  }
   0x9   :  { %1097 = vmatprep.subr.bf16.mxu1 %v2189_v10  ;;  %v2209_v24 = vld [vmem:[%s3119_s1 + $0x1b0] ss:$12 sps:$4 sm:$0xff]   ;;  %v2212_v26 = vld [vmem:[%s3119_s1 + $0x18] ss:$12 sps:$4 sm:$0xff]   ;;  %v2218_v30 = vld [vmem:[%s3119_s1] ss:$12 sps:$4 sm:$0xff]  }
   0xa   :  { %v2213_v25 = vld [vmem:[%s3119_s1 + $0x19c] ss:$12 sps:$4 sm:$0xff]   ;;  %v2216_v27 = vld [vmem:[%s3119_s1 + $0x4] ss:$12 sps:$4 sm:$0xff]   ;;  %v2222_v31 = vld [vmem:[%s3119_s1 + $0x16c] ss:$12 sps:$4 sm:$0xff]  }
   0xb   :  { %1055 = vmatpush1.bf16.msra.mxu0 %v2188_v9  ;;  %v2215_v28 = vld [vmem:[%s3119_s1 + $0x198] ss:$12 sps:$4 sm:$0xff]   ;;  %v2221_v32 = vld [vmem:[%s3119_s1 + $0x180] ss:$12 sps:$4 sm:$0xff]   ;;  %v2224_v34 = vld [vmem:[%s3119_s1 + $0x168] ss:$12 sps:$4 sm:$0xff]  }
   0xc   :  { %1056 = vmatprep.subr.bf16.mxu0 %v2192_v11  ;;  %1098 = vmatpush1.bf16.msra.mxu1 %v2191_v12  ;;  %v2219_v29 = vld [vmem:[%s3119_s1 + $0x184] ss:$12 sps:$4 sm:$0xff]   ;;  %v2225_v33 = vld [vmem:[%s3119_s1 + $0x2ec] ss:$12 sps:$4 sm:$0xff]   ;;  %v2228_v35 = vld [vmem:[%s3119_s1 + $0x154] ss:$12 sps:$4 sm:$0xff]  }
   0xd   :  { %1099 = vmatprep.subr.bf16.mxu1 %v2195_v13  ;;  %v2227_v36 = vld [vmem:[%s3119_s1 + $0x2e8] ss:$12 sps:$4 sm:$0xff]   ;;  %v2230_v38 = vld [vmem:[%s3119_s1 + $0x150] ss:$12 sps:$4 sm:$0xff]   ;;  %v2236_v42 = vld [vmem:[%s3119_s1 + $0x138] ss:$12 sps:$4 sm:$0xff]  }
   0xe   :  { %v2231_v37 = vld [vmem:[%s3119_s1 + $0x2d4] ss:$12 sps:$4 sm:$0xff]   ;;  %v2234_v39 = vld [vmem:[%s3119_s1 + $0x13c] ss:$12 sps:$4 sm:$0xff]   ;;  %v2240_v43 = vld [vmem:[%s3119_s1 + $0x124] ss:$12 sps:$4 sm:$0xff]  }
   0xf   :  { %1057 = vmatpush1.bf16.msra.mxu0 %v2194_v14  ;;  %v2233_v40 = vld [vmem:[%s3119_s1 + $0x2d0] ss:$12 sps:$4 sm:$0xff]   ;;  %v2239_v44 = vld [vmem:[%s3119_s1 + $0x2b8] ss:$12 sps:$4 sm:$0xff]   ;;  %v29_v46 = vld [vmem:[%s3118_s0 + $0x8] sm:$0xff] }
  0x10   :  { %1058 = vmatprep.subr.bf16.mxu0 %v2198_v15  ;;  %1100 = vmatpush1.bf16.msra.mxu1 %v2197_v16  ;;  %v2237_v41 = vld [vmem:[%s3119_s1 + $0x2bc] ss:$12 sps:$4 sm:$0xff]   ;;  %v2243_v45 = vld [vmem:[%s3119_s1 + $0x2a4] ss:$12 sps:$4 sm:$0xff]   ;;  %v2242_v48 = vld [vmem:[%s3119_s1 + $0x120] ss:$12 sps:$4 sm:$0xff]  }
  0x11   :  { %1101 = vmatprep.subr.bf16.mxu1 %v2201_v17  ;;  %v36_v47 = vld [vmem:[%s3118_s0 + $0x40] sm:$0xff]  ;;  %v2246_v50 = vld [vmem:[%s3119_s1 + $0x10c] ss:$12 sps:$4 sm:$0xff]   ;;  %v38_v53 = vld [vmem:[%s3118_s0 + $0x50] sm:$0xff] }
  0x12   :  { %v2625_v49 = vpack.c.bf16 %v36_v47, %v29_v46  ;;  %v2245_v51 = vld [vmem:[%s3119_s1 + $0x2a0] ss:$12 sps:$4 sm:$0xff]   ;;  %v31_v52 = vld [vmem:[%s3118_s0 + $0x18] sm:$0xff]  ;;  %v2248_v56 = vld [vmem:[%s3119_s1 + $0x108] ss:$12 sps:$4 sm:$0xff]  }
  0x13   :  { %1059 = vmatpush1.bf16.msra.mxu0 %v2200_v18  ;;  %v2249_v54 = vld [vmem:[%s3119_s1 + $0x28c] ss:$12 sps:$4 sm:$0xff]   ;;  %v2643_v55 = vpack.c.bf16 %v38_v53, %v31_v52  ;;  %v2252_v57 = vld [vmem:[%s3119_s1 + $0xf4] ss:$12 sps:$4 sm:$0xff]   ;;  %v2254_v60 = vld [vmem:[%s3119_s1 + $0xf0] ss:$12 sps:$4 sm:$0xff]  }
  0x14   :  { %1060 = vmatprep.subr.bf16.mxu0 %v2204_v19  ;;  %1102 = vmatpush1.bf16.msra.mxu1 %v2203_v20  ;;  %v2251_v58 = vld [vmem:[%s3119_s1 + $0x288] ss:$12 sps:$4 sm:$0xff]   ;;  %v2257_v62 = vld [vmem:[%s3119_s1 + $0x270] ss:$12 sps:$4 sm:$0xff]   ;;  %v2260_v0 = vld [vmem:[%s3119_s1 + $0xd8] ss:$12 sps:$4 sm:$0xff]  }
  0x15   :  { %1103 = vmatprep.subr.bf16.mxu1 %v2207_v21  ;;  %1082 = vmatprep.mubr.bf16.mxu0 %v2625_v49  ;;  %v2255_v59 = vld [vmem:[%s3119_s1 + $0x274] ss:$12 sps:$4 sm:$0xff]   ;;  %v2258_v61 = vld [vmem:[%s3119_s1 + $0xdc] ss:$12 sps:$4 sm:$0xff]   ;;  %v2263_v1 = vld [vmem:[%s3119_s1 + $0x258] ss:$12 sps:$4 sm:$0xff]  }
  0x16   :  { %1125 = vmatprep.mubr.bf16.mxu1 %v2643_v55  ;;  %v2261_v63 = vld [vmem:[%s3119_s1 + $0x25c] ss:$12 sps:$4 sm:$0xff]   ;;  %v2264_v2 = vld [vmem:[%s3119_s1 + $0xc4] ss:$12 sps:$4 sm:$0xff]   ;;  %v2266_v3 = vld [vmem:[%s3119_s1 + $0xc0] ss:$12 sps:$4 sm:$0xff]  }
  0x17   :  { %1061 = vmatpush1.bf16.msra.mxu0 %v2206_v22  ;;  %v2267_v4 = vld [vmem:[%s3119_s1 + $0x244] ss:$12 sps:$4 sm:$0xff]   ;;  %v2269_v6 = vld [vmem:[%s3119_s1 + $0x240] ss:$12 sps:$4 sm:$0xff]   ;;  %v35_v7 = vld [vmem:[%s3118_s0 + $0x38] sm:$0xff] }
  0x18   :  { %1062 = vmatprep.subr.bf16.mxu0 %v2210_v23  ;;  %1104 = vmatpush1.bf16.msra.mxu1 %v2209_v24  ;;  %v28_v5 = vld [vmem:[%s3118_s0] sm:$0xff]  ;;  %v2272_v8 = vld [vmem:[%s3119_s1 + $0x3ac] ss:$12 sps:$4 sm:$0xff]   ;;  %v30_v9 = vld [vmem:[%s3118_s0 + $0x10] sm:$0xff] }
  0x19   :  { %1105 = vmatprep.subr.bf16.mxu1 %v2213_v25  ;;  %v37_v10 = vld [vmem:[%s3118_s0 + $0x48] sm:$0xff]  ;;  %v2703_v11 = vpack.c.bf16 %v35_v7, %v28_v5  ;;  %v2273_v12 = vld [vmem:[%s3119_s1 + $0x170] ss:$12 sps:$4 sm:$0xff]   ;;  %v2277_v15 = vld [vmem:[%s3119_s1 + $0x394] ss:$12 sps:$4 sm:$0xff]  }
  0x1a   :  { %v2270_v13 = vld [vmem:[%s3119_s1 + $0x3a8] ss:$12 sps:$4 sm:$0xff]   ;;  %v2711_v14 = vpack.c.bf16 %v37_v10, %v30_v9  ;;  %v2274_v16 = vld [vmem:[%s3119_s1 + $0xb0] ss:$12 sps:$4 sm:$0xff]   ;;  %v2278_v17 = vld [vmem:[%s3119_s1 + $0x158] ss:$12 sps:$4 sm:$0xff]  }
  0x1b   :  { %1063 = vmatpush1.bf16.msra.mxu0 %v2212_v26  ;;  %v2275_v18 = vld [vmem:[%s3119_s1 + $0x390] ss:$12 sps:$4 sm:$0xff]   ;;  %v2279_v20 = vld [vmem:[%s3119_s1 + $0x98] ss:$12 sps:$4 sm:$0xff]   ;;  %v2283_v21 = vld [vmem:[%s3119_s1 + $0x140] ss:$12 sps:$4 sm:$0xff]  }
  0x1c   :  { %1064 = vmatprep.subr.bf16.mxu0 %v2216_v27  ;;  %1106 = vmatpush1.bf16.msra.mxu1 %v2215_v28  ;;  %v2282_v19 = vld [vmem:[%s3119_s1 + $0x37c] ss:$12 sps:$4 sm:$0xff]   ;;  %v2280_v22 = vld [vmem:[%s3119_s1 + $0x378] ss:$12 sps:$4 sm:$0xff]   ;;  %v2284_v24 = vld [vmem:[%s3119_s1 + $0x80] ss:$12 sps:$4 sm:$0xff]  }
  0x1d   :  { %1107 = vmatprep.subr.bf16.mxu1 %v2219_v29  ;;  %v2287_v23 = vld [vmem:[%s3119_s1 + $0x364] ss:$12 sps:$4 sm:$0xff]   ;;  %v2288_v25 = vld [vmem:[%s3119_s1 + $0x128] ss:$12 sps:$4 sm:$0xff]   ;;  %v2285_v26 = vld [vmem:[%s3119_s1 + $0x360] ss:$12 sps:$4 sm:$0xff]  }
  0x1e   :  { %v2292_v27 = vld [vmem:[%s3119_s1 + $0x34c] ss:$12 sps:$4 sm:$0xff]   ;;  %v2289_v28 = vld [vmem:[%s3119_s1 + $0x68] ss:$12 sps:$4 sm:$0xff]   ;;  %v2293_v29 = vld [vmem:[%s3119_s1 + $0x110] ss:$12 sps:$4 sm:$0xff]  }
  0x1f   :  { %1065 = vmatpush1.bf16.msra.mxu0 %v2218_v30  ;;  %v2290_v30 = vld [vmem:[%s3119_s1 + $0x348] ss:$12 sps:$4 sm:$0xff]   ;;  %v2314_v47 = vld [vmem:[%s3119_s1 + $0x230] ss:$12 sps:$4 sm:$0xff]   ;;  %v2338_v5 = vld [vmem:[%s3119_s1 + $0x278] ss:$12 sps:$4 sm:$0xff]  }
  0x20   :  { %1066 = vmatprep.subr.bf16.mxu0 %v2222_v31  ;;  %1108 = vmatpush1.bf16.msra.mxu1 %v2221_v32  ;;  %v2297_v31 = vld [vmem:[%s3119_s1 + $0x334] ss:$12 sps:$4 sm:$0xff]   ;;  %v2294_v32 = vld [vmem:[%s3119_s1 + $0x50] ss:$12 sps:$4 sm:$0xff]  }
  0x21   :  { %1109 = vmatprep.subr.bf16.mxu1 %v2225_v33  ;;  %v2298_v33 = vld [vmem:[%s3119_s1 + $0xf8] ss:$12 sps:$4 sm:$0xff]   ;;  %v2310_v46 = vld [vmem:[%s3119_s1 + $0x468] ss:$12 sps:$4 sm:$0xff]   ;;  %v2315_v52 = vld [vmem:[%s3119_s1 + $0x450] ss:$12 sps:$4 sm:$0xff]  }
  0x22   :  { %v2342_v7 = vld [vmem:[%s3119_s1 + $0x3dc] ss:$12 sps:$4 sm:$0xff]   ;;  %v2343_v9 = vld [vmem:[%s3119_s1 + $0x260] ss:$12 sps:$4 sm:$0xff]  }
  0x23   :  { %1067 = vmatpush2.bf16.msra.mxu0 %v2224_v34  ;;  %v2295_v34 = vld [vmem:[%s3119_s1 + $0x330] ss:$12 sps:$4 sm:$0xff]   ;;  %v2344_v10 = vld [vmem:[%s3119_s1 + $0x1a0] ss:$12 sps:$4 sm:$0xff]  }
  0x24   :  { %1068 = vmatprep.subr.bf16.mxu0 %v2228_v35  ;;  %1110 = vmatpush2.bf16.msra.mxu1 %v2227_v36  ;;  %v2302_v35 = vld [vmem:[%s3119_s1 + $0x31c] ss:$12 sps:$4 sm:$0xff]   ;;  %v2299_v36 = vld [vmem:[%s3119_s1 + $0x38] ss:$12 sps:$4 sm:$0xff]  }
  0x25   :  { %1111 = vmatprep.subr.bf16.mxu1 %v2231_v37  ;;  %v2303_v37 = vld [vmem:[%s3119_s1 + $0xe0] ss:$12 sps:$4 sm:$0xff]  }
  0x27   :  { %1069 = vmatpush2.bf16.msra.mxu0 %v2230_v38  ;;  %v2300_v38 = vld [vmem:[%s3119_s1 + $0x318] ss:$12 sps:$4 sm:$0xff]  }
  0x28   :  { %1070 = vmatprep.subr.bf16.mxu0 %v2234_v39  ;;  %1112 = vmatpush2.bf16.msra.mxu1 %v2233_v40  ;;  %v2307_v39 = vld [vmem:[%s3119_s1 + $0x304] ss:$12 sps:$4 sm:$0xff]   ;;  %v2304_v40 = vld [vmem:[%s3119_s1 + $0x20] ss:$12 sps:$4 sm:$0xff]  }
  0x29   :  { %1113 = vmatprep.subr.bf16.mxu1 %v2237_v41  ;;  %v2308_v41 = vld [vmem:[%s3119_s1 + $0xc8] ss:$12 sps:$4 sm:$0xff]  }
  0x2b   :  { %1071 = vmatpush2.bf16.msra.mxu0 %v2236_v42  ;;  %v2305_v42 = vld [vmem:[%s3119_s1 + $0x300] ss:$12 sps:$4 sm:$0xff]  }
  0x2c   :  { %1072 = vmatprep.subr.bf16.mxu0 %v2240_v43  ;;  %1114 = vmatpush2.bf16.msra.mxu1 %v2239_v44  ;;  %v2312_v43 = vld [vmem:[%s3119_s1 + $0x46c] ss:$12 sps:$4 sm:$0xff]   ;;  %v2309_v44 = vld [vmem:[%s3119_s1 + $0x8] ss:$12 sps:$4 sm:$0xff]  }
  0x2d   :  { %1115 = vmatprep.subr.bf16.mxu1 %v2243_v45  ;;  %v2313_v45 = vld [vmem:[%s3119_s1 + $0x2f0] ss:$12 sps:$4 sm:$0xff]  }
  0x2f   :  { %1073 = vmatpush2.bf16.msra.mxu0 %v2242_v48  ;;  %v2317_v48 = vld [vmem:[%s3119_s1 + $0x454] ss:$12 sps:$4 sm:$0xff]  }
  0x30   :  { %1074 = vmatprep.subr.bf16.mxu0 %v2246_v50  ;;  %1116 = vmatpush2.bf16.msra.mxu1 %v2245_v51  ;;  %v33_v50 = vld [vmem:[%s3118_s0 + $0x28] sm:$0xff]  ;;  %v40_v51 = vld [vmem:[%s3118_s0 + $0x60] sm:$0xff] }
  0x31   :  { %1117 = vmatprep.subr.bf16.mxu1 %v2249_v54  ;;  %v2830_v53 = vpack.c.bf16 %v40_v51, %v33_v50  ;;  %v2322_v54 = vld [vmem:[%s3119_s1 + $0x43c] ss:$12 sps:$4 sm:$0xff]  }
  0x33   :  { %1075 = vmatpush2.bf16.msra.mxu0 %v2248_v56  ;;  %v2319_v56 = vld [vmem:[%s3119_s1 + $0x218] ss:$12 sps:$4 sm:$0xff]  }
  0x34   :  { %1076 = vmatprep.subr.bf16.mxu0 %v2252_v57  ;;  %1118 = vmatpush2.bf16.msra.mxu1 %v2251_v58  ;;  %v2320_v57 = vld [vmem:[%s3119_s1 + $0x438] ss:$12 sps:$4 sm:$0xff]   ;;  %v2323_v58 = vld [vmem:[%s3119_s1 + $0x2c0] ss:$12 sps:$4 sm:$0xff]  }
  0x35   :  { %1119 = vmatprep.subr.bf16.mxu1 %v2255_v59  ;;  %v2324_v59 = vld [vmem:[%s3119_s1 + $0x200] ss:$12 sps:$4 sm:$0xff]  }
  0x37   :  { %1077 = vmatpush2.bf16.msra.mxu0 %v2254_v60  ;;  %v2327_v60 = vld [vmem:[%s3119_s1 + $0x424] ss:$12 sps:$4 sm:$0xff]  }
  0x38   :  { %1078 = vmatprep.subr.bf16.mxu0 %v2258_v61  ;;  %1120 = vmatpush2.bf16.msra.mxu1 %v2257_v62  ;;  %v2325_v61 = vld [vmem:[%s3119_s1 + $0x420] ss:$12 sps:$4 sm:$0xff]   ;;  %v2329_v62 = vld [vmem:[%s3119_s1 + $0x1e8] ss:$12 sps:$4 sm:$0xff]  }
  0x39   :  { %1121 = vmatprep.subr.bf16.mxu1 %v2261_v63  ;;  %v2332_v63 = vld [vmem:[%s3119_s1 + $0x40c] ss:$12 sps:$4 sm:$0xff]  }
  0x3b   :  { %1079 = vmatpush2.bf16.msra.mxu0 %v2260_v0  ;;  %v2330_v0 = vld [vmem:[%s3119_s1 + $0x408] ss:$12 sps:$4 sm:$0xff]  }
  0x3c   :  { %1080 = vmatprep.subr.bf16.mxu0 %v2264_v2  ;;  %1122 = vmatpush2.bf16.msra.mxu1 %v2263_v1  ;;  %v2333_v1 = vld [vmem:[%s3119_s1 + $0x290] ss:$12 sps:$4 sm:$0xff]  }
  0x3d   :  { %1123 = vmatprep.subr.bf16.mxu1 %v2267_v4  ;;  %v2334_v2 = vld [vmem:[%s3119_s1 + $0x1d0] ss:$12 sps:$4 sm:$0xff]  }
  0x3e   :  { %v2335_v4 = vld [vmem:[%s3119_s1 + $0x3f0] ss:$12 sps:$4 sm:$0xff]  }
  0x3f   :  { %1081 = vmatpush2.bf16.msra.mxu0 %v2266_v3  ;;  %v2337_v3 = vld [vmem:[%s3119_s1 + $0x3f4] ss:$12 sps:$4 sm:$0xff]  }
  0x40   :  { %1136 = vmatprep.subr.bf16.mxu0 %v2272_v8  ;;  %1124 = vmatpush2.bf16.msra.mxu1 %v2269_v6  ;;  %v2339_v6 = vld [vmem:[%s3119_s1 + $0x1b8] ss:$12 sps:$4 sm:$0xff]  }
  0x41   :  { %2014 = vmatprep.subr.bf16.mxu1 %v2273_v12  ;;  %v2340_v8 = vld [vmem:[%s3119_s1 + $0x3d8] ss:$12 sps:$4 sm:$0xff]   ;;  %v2348_v12 = vld [vmem:[%s3119_s1 + $0x248] ss:$12 sps:$4 sm:$0xff]  }
  0x42   :  { %1083 = vmatmul.mubr.bf16.vlgmr.msra.gmra.mxu0 %v2703_v11 }
  0x43   :  { %1137 = vmatpush1.bf16.msra.mxu0 %v2270_v13  ;;  %1126 = vmatmul.mubr.bf16.vlgmr.msra.gmra.mxu1 %v2711_v14  ;;  %v2345_v13 = vld [vmem:[%s3119_s1 + $0x3c0] ss:$12 sps:$4 sm:$0xff]  }
  0x44   :  { %1138 = vmatprep.subr.bf16.mxu0 %v2277_v15  ;;  %2015 = vmatpush3.bf16.msra.mxu1 %v2274_v16  ;;  %v32_v15 = vld [vmem:[%s3118_s0 + $0x20] sm:$0xff]  ;;  %v39_v16 = vld [vmem:[%s3118_s0 + $0x58] sm:$0xff] }
  0x45   :  { %1254 = vmatprep.mubr.bf16.mxu1 %v2625_v49  ;;  %2016 = vmatprep.subr.bf16.mxu1 %v2278_v17  ;;  %v2318_v49 = vld [vmem:[%s3119_s1 + $0x2d8] ss:$12 sps:$4 sm:$0xff]  }
  0x46   :  { %1168 = vmatprep.mubr.bf16.mxu0 %v2830_v53  ;;  %v2352_v17 = vld [vmem:[%s3119_s1 + $0x484] ss:$12 sps:$4 sm:$0xff]  }
  0x47   :  { %1139 = vmatpush1.bf16.msra.mxu0 %v2275_v18  ;;  %v2349_v18 = vld [vmem:[%s3119_s1 + $0x188] ss:$12 sps:$4 sm:$0xff]  }
  0x48   :  { %1140 = vmatprep.subr.bf16.mxu0 %v2282_v19  ;;  %2017 = vmatpush3.bf16.msra.mxu1 %v2279_v20  ;;  %v2350_v19 = vld [vmem:[%s3119_s1 + $0x480] ss:$12 sps:$4 sm:$0xff]   ;;  %v2922_v20 = vpack.c.bf16 %v39_v16, %v32_v15 }
  0x49   :  { %2018 = vmatprep.subr.bf16.mxu1 %v2283_v21  ;;  %v2353_v21 = vld [vmem:[%s3119_s1 + $0x470] ss:$12 sps:$4 sm:$0xff]  }
  0x4b   :  { %1141 = vmatpush1.bf16.msra.mxu0 %v2280_v22  ;;  %v2369_v22 = vld [vmem:[%s3119_s1 + $0x488] ss:$12 sps:$4 sm:$0xff]  }
  0x4c   :  { %1142 = vmatprep.subr.bf16.mxu0 %v2287_v23  ;;  %2019 = vmatpush3.bf16.msra.mxu1 %v2284_v24  ;;  %v34_v23 = vld [vmem:[%s3118_s0 + $0x30] sm:$0xff]  ;;  %v41_v24 = vld [vmem:[%s3118_s0 + $0x68] sm:$0xff] }
  0x4d   :  { %2020 = vmatprep.subr.bf16.mxu1 %v2288_v25  ;;  %v2432_v25 = vmov 0.0  }
  0x4f   :  { %1143 = vmatpush1.bf16.msra.mxu0 %v2285_v26  ;;  %v2433_v26 = vmov 0  }
  0x50   :  { %1144 = vmatprep.subr.bf16.mxu0 %v2292_v27  ;;  %2021 = vmatpush3.bf16.msra.mxu1 %v2289_v28  ;;  %v2354_v27 = vld [vmem:[%s3119_s1 + $0x3b0] ss:$12 sps:$4 sm:$0xff]   ;;  %v48_v28 = vpack.c.bf16 %v41_v24, %v34_v23 }
  0x51   :  { %2022 = vmatprep.subr.bf16.mxu1 %v2293_v29  ;;  %v2355_v29 = vld [vmem:[%s3119_s1 + $0x458] ss:$12 sps:$4 sm:$0xff]  }
  0x53   :  { %1145 = vmatpush1.bf16.msra.mxu0 %v2290_v30  ;;  %v2356_v30 = vld [vmem:[%s3119_s1 + $0x398] ss:$12 sps:$4 sm:$0xff]  }
  0x54   :  { %1146 = vmatprep.subr.bf16.mxu0 %v2297_v31  ;;  %2023 = vmatpush3.bf16.msra.mxu1 %v2294_v32  ;;  %v2370_v31 = vld [vmem:[%s3121_s3 + $0x78] sm:$0xff]  }
  0x55   :  { %2024 = vmatprep.subr.bf16.mxu1 %v2298_v33  ;;  %v2371_v32 = vld [vmem:[%s3121_s3 + $0x38] sm:$0xff]  }
  0x57   :  { %1147 = vmatpush1.bf16.msra.mxu0 %v2295_v34 }
  0x58   :  { %1148 = vmatprep.subr.bf16.mxu0 %v2302_v35  ;;  %2025 = vmatpush3.bf16.msra.mxu1 %v2299_v36 }
  0x59   :  { %2026 = vmatprep.subr.bf16.mxu1 %v2303_v37 }
  0x5b   :  { %1149 = vmatpush1.bf16.msra.mxu0 %v2300_v38 }
  0x5c   :  { %1150 = vmatprep.subr.bf16.mxu0 %v2307_v39  ;;  %2027 = vmatpush3.bf16.msra.mxu1 %v2304_v40 }
  0x5d   :  { %2028 = vmatprep.subr.bf16.mxu1 %v2308_v41 }
  0x5f   :  { %1151 = vmatpush1.bf16.msra.mxu0 %v2305_v42 }
  0x60   :  { %1152 = vmatprep.subr.bf16.mxu0 %v2312_v43  ;;  %2029 = vmatpush3.bf16.msra.mxu1 %v2309_v44 }
  0x61   :  { %2036 = vmatprep.subr.bf16.mxu1 %v2313_v45 }
  0x63   :  { %1153 = vmatpush2.bf16.msra.mxu0 %v2310_v46  ;;  %1255 = vmatmul.mubr.bf16.vlgmr.msra.gmra.mxu1 %v2703_v11  ;;  %v2347_v11 = vld [vmem:[%s3119_s1 + $0x3c4] ss:$12 sps:$4 sm:$0xff]  }
  0x64   :  { %1154 = vmatprep.subr.bf16.mxu0 %v2317_v48  ;;  %2037 = vmatpush3.bf16.msra.mxu1 %v2314_v47 }
  0x65   :  { %2038 = vmatprep.subr.bf16.mxu1 %v2318_v49  ;;  %1295 = vmatprep.mubr.bf16.mxu1 %v2643_v55  ;;  %v2328_v55 = vld [vmem:[%s3119_s1 + $0x2a8] ss:$12 sps:$4 sm:$0xff]  }
  0x67   :  { %1155 = vmatpush2.bf16.msra.mxu0 %v2315_v52 }
  0x68   :  { %1156 = vmatprep.subr.bf16.mxu0 %v2322_v54  ;;  %2039 = vmatpush3.bf16.msra.mxu1 %v2319_v56 }
  0x69   :  { %2040 = vmatprep.subr.bf16.mxu1 %v2323_v58 }
  0x6b   :  { %1157 = vmatpush2.bf16.msra.mxu0 %v2320_v57 }
  0x6c   :  { %1158 = vmatprep.subr.bf16.mxu0 %v2327_v60  ;;  %2041 = vmatpush3.bf16.msra.mxu1 %v2324_v59 }
  0x6d   :  { %2042 = vmatprep.subr.bf16.mxu1 %v2328_v55 }
  0x6f   :  { %1159 = vmatpush2.bf16.msra.mxu0 %v2325_v61 }
  0x70   :  { %1160 = vmatprep.subr.bf16.mxu0 %v2332_v63  ;;  %2043 = vmatpush3.bf16.msra.mxu1 %v2329_v62 }
  0x71   :  { %2044 = vmatprep.subr.bf16.mxu1 %v2333_v1 }
  0x73   :  { %1161 = vmatpush2.bf16.msra.mxu0 %v2330_v0 }
  0x74   :  { %1162 = vmatprep.subr.bf16.mxu0 %v2337_v3  ;;  %2045 = vmatpush3.bf16.msra.mxu1 %v2334_v2 }
  0x75   :  { %2046 = vmatprep.subr.bf16.mxu1 %v2338_v5 }
  0x77   :  { %1163 = vmatpush2.bf16.msra.mxu0 %v2335_v4 }
  0x78   :  { %1164 = vmatprep.subr.bf16.mxu0 %v2342_v7  ;;  %2047 = vmatpush3.bf16.msra.mxu1 %v2339_v6 }
  0x79   :  { %2048 = vmatprep.subr.bf16.mxu1 %v2343_v9 }
  0x7b   :  { %1165 = vmatpush2.bf16.msra.mxu0 %v2340_v8 }
  0x7c   :  { %1166 = vmatprep.subr.bf16.mxu0 %v2347_v11  ;;  %2049 = vmatpush3.bf16.msra.mxu1 %v2344_v10 }
  0x7d   :  { %2050 = vmatprep.subr.bf16.mxu1 %v2348_v12 }
  0x7f   :  { %1167 = vmatpush2.bf16.msra.mxu0 %v2345_v13 }
  0x80   :  { %1193 = vmatprep.subr.bf16.mxu0 %v2352_v17  ;;  %2051 = vmatpush3.bf16.msra.mxu1 %v2349_v18 }
  0x81   :  { %2122 = vmatprep.subr.bf16.mxu1 %v2432_v25 }
  0x82   :  { %1169 = vmatmul.mubr.bf16.vlgmr.msra.gmra.mxu0 %v2922_v20 }
  0x83   :  { %1194 = vmatpush1.bf16.msra.mxu0 %v2350_v19  ;;  %1211 = vmatprep.mubr.bf16.mxu0 %v2433_v26 }
  0x84   :  { %1296 = vmatmul.mubr.bf16.vlgmr.msra.gmra.mxu1 %v2711_v14  ;;  %2058 = vmatprep.subr.bf16.mxu0 %v2353_v21  ;;  %v2357_v14 = vld [vmem:[%s3119_s1 + $0x440] ss:$12 sps:$4 sm:$0xff]  }
  0x85   :  { %2123 = vmatpush3.bf16.msra.mxu1 %v2369_v22  ;;  %2124 = vmatprep.mubr.msk.bf16.mxu1 %vm2434_vm1, %v2432_v25 }
  0x86   :  { %2082 = vmatprep.subr.bf16.mxu1 %v2370_v31 }
  0x8a   :  { %1978 = vmatmul.mubr.msk.bf16.vlgmr.msra.gmra.mxu0 %vm1046_vm0, %v48_v28 }
  0x8b   :  { %2059 = vmatpush3.bf16.msra.mxu0 %v2354_v27  ;;  %1336 = vmatprep.mubr.bf16.mxu0 %v2830_v53 }
  0x8c   :  { %2060 = vmatprep.subr.bf16.mxu0 %v2355_v29  ;;  %2125 = vmatmul.mubr.msk.bf16.vlgmr.msra.gmra.mxu1 %vm1046_vm0, %v48_v28 }
  0x8d   :  { %12 = vsyncpa [#allocation3], 0  ;;  %2083 = vmatpush3.bf16.msra.mxu1 %v2371_v32  ;;  %v2358_v33 = vld [vmem:[%s3119_s1 + $0x380] ss:$12 sps:$4 sm:$0xff]   ;;  %v2359_v34 = vld [vmem:[%s3119_s1 + $0x428] ss:$12 sps:$4 sm:$0xff]   ;;  %v247_v8 = vlaneseq }
  0x8e   :  { %v2360_v35 = vld [vmem:[%s3119_s1 + $0x368] ss:$12 sps:$4 sm:$0xff]   ;;  %v2361_v36 = vld [vmem:[%s3119_s1 + $0x410] ss:$12 sps:$4 sm:$0xff]   ;;  %v2363_v38 = vld [vmem:[%s3119_s1 + $0x3f8] ss:$12 sps:$4 sm:$0xff]  }
  0x8f   :  { %2061 = vmatpush3.bf16.msra.mxu0 %v2356_v30  ;;  %v2362_v37 = vld [vmem:[%s3119_s1 + $0x350] ss:$12 sps:$4 sm:$0xff]   ;;  %v2364_v39 = vld [vmem:[%s3119_s1 + $0x338] ss:$12 sps:$4 sm:$0xff]   ;;  %v2365_v40 = vld [vmem:[%s3119_s1 + $0x3e0] ss:$12 sps:$4 sm:$0xff]  }
  0x90   :  { %2062 = vmatprep.subr.bf16.mxu0 %v2357_v14  ;;  %v2366_v41 = vld [vmem:[%s3119_s1 + $0x320] ss:$12 sps:$4 sm:$0xff]   ;;  %v2367_v42 = vld [vmem:[%s3119_s1 + $0x3c8] ss:$12 sps:$4 sm:$0xff]   ;;  %v2378_v50 = vld [vmem:[%s3121_s3 + $0x58] sm:$0xff]   ;;  %v248_v11 = vshrl.u32 %v247_v8, 7 }
  0x91   :  { %v2368_v43 = vld [vmem:[%s3119_s1 + $0x308] ss:$12 sps:$4 sm:$0xff]   ;;  %v2376_v48 = vld [vmem:[%s3121_s3 + $0x60] sm:$0xff]   ;;  %v2379_v51 = vld [vmem:[%s3121_s3 + $0x18] sm:$0xff]  }
  0x92   :  { %v2372_v44 = vld [vmem:[%s3121_s3 + $0x70] sm:$0xff]   ;;  %v2374_v46 = vld [vmem:[%s3121_s3 + $0x68] sm:$0xff]   ;;  %v2377_v49 = vld [vmem:[%s3121_s3 + $0x20] sm:$0xff]   ;;  %v253_v15 = vsub.s32 1, %v248_v11  ;;  %v249_v17 = vsub.s32 0, %v248_v11 }
  0x93   :  { %2063 = vmatpush3.bf16.msra.mxu0 %v2358_v33  ;;  %v2373_v45 = vld [vmem:[%s3121_s3 + $0x30] sm:$0xff]   ;;  %2084 = vmatprep.subr.bf16.mxu1 %v2372_v44  ;;  %v2375_v47 = vld [vmem:[%s3121_s3 + $0x28] sm:$0xff]   ;;  %v2384_v57 = vld [vmem:[%s3121_s3 + $0x40] sm:$0xff]  }
  0x94   :  { %2064 = vmatprep.subr.bf16.mxu0 %v2359_v34  ;;  %2085 = vmatpush3.bf16.msra.mxu1 %v2373_v45  ;;  %v2380_v52 = vld [vmem:[%s3121_s3 + $0x50] sm:$0xff]   ;;  %v2382_v54 = vld [vmem:[%s3121_s3 + $0x48] sm:$0xff]   ;;  %v2385_v58 = vld [vmem:[%s3121_s3] sm:$0xff]  }
  0x95   :  { %2086 = vmatprep.subr.bf16.mxu1 %v2374_v46  ;;  %v2381_v53 = vld [vmem:[%s3121_s3 + $0x10] sm:$0xff]   ;;  %v2383_v56 = vld [vmem:[%s3121_s3 + $0x8] sm:$0xff]   ;;  %v2386_v59 = vld [vmem:[%s3121_s3 + $0xb8] sm:$0xff]  }
  0x96   :  { %v2387_v60 = vld [vmem:[%s3121_s3 + $0xb0] sm:$0xff]   ;;  %v2388_v61 = vld [vmem:[%s3121_s3 + $0xa8] sm:$0xff]   ;;  %v2389_v55 = vld [vmem:[%s3121_s3 + $0xa0] sm:$0xff]  }
  0x97   :  { %2065 = vmatpush3.bf16.msra.mxu0 %v2360_v35  ;;  %v2390_v62 = vld [vmem:[%s3121_s3 + $0x98] sm:$0xff]   ;;  %v2391_v63 = vld [vmem:[%s3121_s3 + $0x90] sm:$0xff]   ;;  %v2392_v0 = vld [vmem:[%s3121_s3 + $0x88] sm:$0xff]  }
  0x98   :  { %2066 = vmatprep.subr.bf16.mxu0 %v2361_v36  ;;  %2087 = vmatpush3.bf16.msra.mxu1 %v2375_v47  ;;  %v2393_v1 = vld [vmem:[%s3121_s3 + $0x80] sm:$0xff]  }
  0x99   :  { %2088 = vmatprep.subr.bf16.mxu1 %v2376_v48  ;;  %v245_v16 = vld [vmem:[%s3120_s2] sm:$0x7] }
  0x9a   :  { %v254_v21 = vrot.slane %v245_v16, %v253_v15  ;;  %v250_v22 = vrot.slane %v245_v16, %v249_v17 }
  0x9b   :  { %2067 = vmatpush3.bf16.msra.mxu0 %v2362_v37 }
  0x9c   :  { %2068 = vmatprep.subr.bf16.mxu0 %v2363_v38  ;;  %2089 = vmatpush3.bf16.msra.mxu1 %v2377_v49 }
  0x9d   :  { %2090 = vmatprep.subr.bf16.mxu1 %v2378_v50 }
  0x9f   :  { %2069 = vmatpush3.bf16.msra.mxu0 %v2364_v39 }
  0xa0   :  { %2070 = vmatprep.subr.bf16.mxu0 %v2365_v40  ;;  %2091 = vmatpush3.bf16.msra.mxu1 %v2379_v51 }
  0xa1   :  { %2092 = vmatprep.subr.bf16.mxu1 %v2380_v52 }
  0xa3   :  { %2071 = vmatpush3.bf16.msra.mxu0 %v2366_v41 }
  0xa4   :  { %2072 = vmatprep.subr.bf16.mxu0 %v2367_v42  ;;  %2093 = vmatpush3.bf16.msra.mxu1 %v2381_v53 }
  0xa5   :  { %2094 = vmatprep.subr.bf16.mxu1 %v2382_v54 }
  0xa7   :  { %2073 = vmatpush3.bf16.msra.mxu0 %v2368_v43 }
  0xa8   :  { %2128 = vmatprep.subr.bf16.mxu0 %v2432_v25  ;;  %2095 = vmatpush3.bf16.msra.mxu1 %v2383_v56 }
  0xa9   :  { %2096 = vmatprep.subr.bf16.mxu1 %v2384_v57 }
  0xaa   :  { %1337 = vmatmul.mubr.bf16.vlgmr.msra.gmra.mxu0 %v2922_v20 }
  0xab   :  { %2144 = vmatprep.mubr.msk.bf16.mxu0 %vm2434_vm1, %v2432_v25  ;;  %2129 = vmatpush3.bf16.msra.mxu0 %v2386_v59 }
  0xac   :  { %2097 = vmatpush3.bf16.msra.mxu1 %v2385_v58  ;;  %2130 = vmatprep.subr.bf16.mxu0 %v2432_v25 }
  0xad   :  { %2148 = vmatprep.subr.bf16.mxu1 %v2432_v25 }
  0xaf   :  { %2131 = vmatpush3.bf16.msra.mxu0 %v2387_v60 }
  0xb0   :  { %2132 = vmatprep.subr.bf16.mxu0 %v2432_v25 }
  0xb3   :  { %2133 = vmatpush3.bf16.msra.mxu0 %v2388_v61  ;;  %v257_v61 = vsub.s32 2, %v248_v11 }
  0xb4   :  { %2134 = vmatprep.subr.bf16.mxu0 %v2432_v25 }
  0xb7   :  { %2135 = vmatpush3.bf16.msra.mxu0 %v2389_v55  ;;  %v258_v55 = vrot.slane %v245_v16, %v257_v61 }
  0xb8   :  { %2136 = vmatprep.subr.bf16.mxu0 %v2432_v25 }
  0xbb   :  { %2137 = vmatpush3.bf16.msra.mxu0 %v2390_v62 }
  0xbc   :  { %2138 = vmatprep.subr.bf16.mxu0 %v2432_v25 }
  0xbf   :  { %2139 = vmatpush3.bf16.msra.mxu0 %v2391_v63 }
  0xc0   :  { %2140 = vmatprep.subr.bf16.mxu0 %v2432_v25 }
  0xc3   :  { %2141 = vmatpush3.bf16.msra.mxu0 %v2392_v0 }
  0xc4   :  { %2142 = vmatprep.subr.bf16.mxu0 %v2432_v25 }
  0xc7   :  { %2143 = vmatpush3.bf16.msra.mxu0 %v2393_v1 }
 0x102   :  { %v1084_v6 = vpop.f32.mrf.mxu0 }
 0x103   :  { %v1127_v2 = vpop.f32.mrf.mxu1  ;;  %v1085_v30 = vadd.f32 %v1084_v6, %v250_v22 }
 0x104   :  { %v1086_v9 = vpop.f32.mrf.mxu0 }
 0x105   :  { %v1129_v3 = vpop.f32.mrf.mxu1  ;;  %v1087_v28 = vadd.f32 %v1086_v9, %v254_v21  ;;  %v1128_v37 = vadd.f32 %v1127_v2, %v1085_v30 }
 0x106   :  { %v1088_v12 = vpop.f32.mrf.mxu0 }
 0x107   :  { %v1131_v4 = vpop.f32.mrf.mxu1  ;;  %v1089_v29 = vadd.f32 %v1088_v12, %v250_v22  ;;  %v1130_v35 = vadd.f32 %v1129_v3, %v1087_v28  ;;  %v2401_v28 = vld [vmem:[%s3123_s5] sm:$0xff]  }
 0x108   :  { %v1090_v18 = vpop.f32.mrf.mxu0 }
 0x109   :  { %v1133_v5 = vpop.f32.mrf.mxu1  ;;  %v1091_v32 = vadd.f32 %v1090_v18, %v254_v21  ;;  %v1132_v36 = vadd.f32 %v1131_v4, %v1089_v29 }
 0x10b   :  { %v1134_v40 = vadd.f32 %v1133_v5, %v1091_v32 }
 0x123   :  { %v2030_v7 = vpop.f32.mrf.mxu1 }
 0x125   :  { %v2031_v10 = vpop.f32.mrf.mxu1 }
 0x126   :  { %v2032_v62 = vadd.f32 %v2031_v10, %v2030_v7  ;;  %v2394_v10 = vld [vmem:[%s3123_s5 + $0x38] sm:$0xff]  }
 0x127   :  { %v2033_v13 = vpop.f32.mrf.mxu1 }
 0x128   :  { %v1257_v63 = vadd.f32 %v2032_v62, %v258_v55 }
 0x129   :  { %v2034_v19 = vpop.f32.mrf.mxu1 }
 0x12a   :  { %v2035_v0 = vadd.f32 %v2034_v19, %v2033_v13  ;;  %v2395_v13 = vld [vmem:[%s3123_s5 + $0x30] sm:$0xff]   ;;  %v2396_v19 = vld [vmem:[%s3123_s5 + $0x28] sm:$0xff]  }
 0x12c   :  { %v1260_v4 = vadd.f32 %v2035_v0, %v258_v55 }
 0x142   :  { %v1170_v20 = vpop.f32.mrf.mxu0 }
 0x143   :  { %v1171_v43 = vadd.f32 %v1170_v20, %v1128_v37 }
 0x144   :  { %v1172_v23 = vpop.f32.mrf.mxu0  ;;  %v2052_v24 = vpop.f32.mrf.mxu1 }
 0x145   :  { %v1173_v41 = vadd.f32 %v1172_v23, %v1130_v35  ;;  %v2397_v23 = vld [vmem:[%s3123_s5 + $0x20] sm:$0xff]  }
 0x146   :  { %v1174_v26 = vpop.f32.mrf.mxu0  ;;  %v2053_v27 = vpop.f32.mrf.mxu1 }
 0x147   :  { %v1175_v42 = vadd.f32 %v1174_v26, %v1132_v36  ;;  %v2054_v1 = vadd.f32 %v2053_v27, %v2052_v24  ;;  %v2398_v24 = vld [vmem:[%s3123_s5 + $0x18] sm:$0xff]   ;;  %v2399_v26 = vld [vmem:[%s3123_s5 + $0x10] sm:$0xff]   ;;  %v2400_v27 = vld [vmem:[%s3123_s5 + $0x8] sm:$0xff]  }
 0x148   :  { %v1176_v14 = vpop.f32.mrf.mxu0  ;;  %v2055_v31 = vpop.f32.mrf.mxu1 }
 0x149   :  { %v1177_v46 = vadd.f32 %v1176_v14, %v1134_v40  ;;  %v1298_v5 = vadd.f32 %v2054_v1, %v1257_v63 }
 0x14a   :  { %v1213_v33 = vpop.f32.mrf.mxu0  ;;  %v2056_v34 = vpop.f32.mrf.mxu1 }
 0x14b   :  { %v1214_v49 = vadd.f32 %v1213_v33, %v1171_v43  ;;  %v2057_v6 = vadd.f32 %v2056_v34, %v2055_v31  ;;  %v1980_v33 = vld [vmem:[%s3122_s4] ss:$0 sm:$0xff]  ;;  %s2435_s4 = smov [#allocation2]  }
 0x14c   :  { %v1215_v38 = vpop.f32.mrf.mxu0  ;;  %v1379_v39 = vpop.f32.mrf.mxu1 }
 0x14d   :  { %v1216_v47 = vadd.f32 %v1215_v38, %v1173_v41  ;;  %v1386_v58 = vmax.f32 %v1214_v49, 0.0  ;;  %v1301_v17 = vadd.f32 %v2057_v6, %v1260_v4 }
 0x14e   :  { %v1217_v44 = vpop.f32.mrf.mxu0  ;;  %v2126_v45 = vpop.f32.mrf.mxu1 }
 0x14f   :  { %v1218_v48 = vadd.f32 %v1217_v44, %v1175_v42  ;;  %v1387_v56 = vmax.f32 %v1216_v47, 0.0  ;;  %v2005_v45 = vld [vmem:[%s3124_s6] ss:$0 sm:$0xff]  ;;  %s1820_s6 = sshll.u32 %s2435_s4, 4  ;;  %s1821_s6 = int_to_ptr.vmem [resolvable:$true] %s1820_s6 }
 0x150   :  { %v1219_v50 = vpop.f32.mrf.mxu0  ;;  %v1382_v51 = vpop.f32.mrf.mxu1  ;;  %s2410_s15 = scalar_lea.vmem %s1821_s6, 256  ;;  %p2415_p1 = scmp.lt.s32.totalorder %s1821_s6, %s1821_s6 }
 0x151   :  { %v1220_v52 = vadd.f32 %v1219_v50, %v1177_v46  ;;  %v1389_v53 = vmax.f32 %v1218_v48, 0.0  ;;  %p2411_p0 = scmp.ne.s32.totalorder %s1821_s6, %s2410_s15  ;;  %p2416_p2 = scmp.lt.s32.totalorder %s2410_s15, %s2410_s15 }
 0x152   :  { %v2127_v54 = vpop.f32.mrf.mxu1 }
 0x153   :  { %v1390_v57 = vmax.f32 %v1220_v52, 0.0  ;;  %v1392_v60 = vpack.c.bf16 %v1389_v53, %v1386_v58  ;;  %p2417_p3 = por %p2416_p2, %p2415_p1 }
 0x155   :  { %v1393_v59 = vpack.c.bf16 %v1390_v57, %v1387_v56  ;;  %p2418_p4 = pnand %p2417_p3, %p2411_p0 }
 0x157   :  { %1626 = vmatprep.mubr.bf16.mxu1 %v1393_v59 }
 0x158   :  { %1627 = vmatmul.mubr.bf16.vlgmr.msra.gmra.mxu1 %v1392_v60 }
 0x159   :  { %2164 = vmatprep.mubr.msk.bf16.mxu1 %vm2434_vm1, %v2432_v25  ;;  %2149 = vmatpush3.bf16.msra.mxu1 %v2394_v10 }
 0x15a   :  { %2150 = vmatprep.subr.bf16.mxu1 %v2432_v25 }
 0x15d   :  { %2151 = vmatpush3.bf16.msra.mxu1 %v2395_v13 }
 0x15e   :  { %2152 = vmatprep.subr.bf16.mxu1 %v2432_v25 }
 0x161   :  { %2153 = vmatpush3.bf16.msra.mxu1 %v2396_v19 }
 0x162   :  { %2154 = vmatprep.subr.bf16.mxu1 %v2432_v25 }
 0x165   :  { %2155 = vmatpush3.bf16.msra.mxu1 %v2397_v23 }
 0x166   :  { %2156 = vmatprep.subr.bf16.mxu1 %v2432_v25 }
 0x169   :  { %2157 = vmatpush3.bf16.msra.mxu1 %v2398_v24 }
 0x16a   :  { %v2074_v2 = vpop.f32.mrf.mxu0  ;;  %2158 = vmatprep.subr.bf16.mxu1 %v2432_v25 }
 0x16c   :  { %v2075_v3 = vpop.f32.mrf.mxu0 }
 0x16d   :  { %v2076_v8 = vadd.f32 %v2075_v3, %v2074_v2  ;;  %2159 = vmatpush3.bf16.msra.mxu1 %v2399_v26 }
 0x16e   :  { %v2077_v9 = vpop.f32.mrf.mxu0  ;;  %2160 = vmatprep.subr.bf16.mxu1 %v2432_v25 }
 0x16f   :  { %v1339_v12 = vadd.f32 %v2076_v8, %v1298_v5 }
 0x170   :  { %v2078_v15 = vpop.f32.mrf.mxu0 }
 0x171   :  { %v2079_v18 = vadd.f32 %v2078_v15, %v2077_v9  ;;  %v1380_v20 = vadd.f32 %v1379_v39, %v1339_v12  ;;  %2161 = vmatpush3.bf16.msra.mxu1 %v2400_v27 }
 0x172   :  { %2162 = vmatprep.subr.bf16.mxu1 %v2432_v25 }
 0x173   :  { %v1342_v21 = vadd.f32 %v2079_v18, %v1301_v17  ;;  %v1388_v11 = vmax.f32 %v1380_v20, 0.0 }
 0x175   :  { %v1383_v22 = vadd.f32 %v1382_v51, %v1342_v21  ;;  %2163 = vmatpush3.bf16.msra.mxu1 %v2401_v28 }
 0x177   :  { %v1391_v16 = vmax.f32 %v1383_v22, 0.0 }
 0x179   :  { %v1394_v7 = vpack.c.bf16 %v1391_v16, %v1388_v11 }
 0x17b   :  { %2145 = vmatmul.mubr.bf16.vlgmr.msra.gmra.mxu0 %v1394_v7 }
 0x218   :  { %v2098_v29 = vpop.f32.mrf.mxu1 }
 0x21a   :  { %v2099_v30 = vpop.f32.mrf.mxu1 }
 0x21b   :  { %v2100_v32 = vadd.f32 %v2099_v30, %v2098_v29 }
 0x21c   :  { %v2101_v14 = vpop.f32.mrf.mxu1 }
 0x21d   :  { %v1629_v36 = vadd.f32 %v2100_v32, %v1980_v33 }
 0x21e   :  { %v2102_v31 = vpop.f32.mrf.mxu1 }
 0x21f   :  { %v2103_v34 = vadd.f32 %v2102_v31, %v2101_v14 }
 0x221   :  { %v1632_v25 = vadd.f32 %v2103_v34, %v1980_v33 }
 0x23b   :  { %v1669_v35 = vpop.f32.mrf.mxu0 }
 0x23c   :  { %v1670_v38 = vadd.f32 %v1669_v35, %v1629_v36 }
 0x23d   :  { %v2146_v37 = vpop.f32.mrf.mxu0 }
 0x23e   :  { %v1676_v42 = vmax.f32 %v1670_v38, 0.0 }
 0x23f   :  { %v1672_v39 = vpop.f32.mrf.mxu0 }
 0x240   :  { %v1673_v40 = vadd.f32 %v1672_v39, %v1632_v25 }
 0x241   :  { %v2147_v41 = vpop.f32.mrf.mxu0 }
 0x242   :  { %v1677_v43 = vmax.f32 %v1673_v40, 0.0 }
 0x244   :  { %v1678_v44 = vpack.c.bf16 %v1677_v43, %v1676_v42 }
 0x246   :  { %2165 = vmatmul.mubr.bf16.vlgmr.msra.gmra.mxu1 %v1678_v44 }
 0x306   :  { %v1784_v46 = vpop.f32.mrf.mxu1 }
 0x307   :  { %v1785_v47 = vadd.f32 %v2005_v45, %v1784_v46 }
 0x308   :  { %v2166_v48 = vpop.f32.mrf.mxu1 }
 0x309   :  { %1791 = vmax.xlane.f32.xlu0 %v1785_v47 }
 0x30a   :  { %v1787_v49 = vpop.f32.mrf.mxu1 }
 0x30b   :  { %v1788_v50 = vadd.f32 %v2005_v45, %v1787_v49 }
 0x30c   :  { %v2167_v51 = vpop.f32.mrf.mxu1 }
 0x30d   :  { %1793 = vmax.xlane.f32.xlu0 %v1788_v50 }
 0x392   :  { %v1792_v52 = vpop.xlane.xlu0 %1791 }
 0x393   :  { %v1795_v53 = vsub.f32 %v1785_v47, %v1792_v52 }
 0x395   :  { %v1797_v54 = vmul.f32 1.442695, %v1795_v53 }
 0x396   :  { %v1794_v56 = vpop.xlane.xlu0 %1793 }
 0x397   :  { %2402 = vpow2.f32 %v1797_v54  ;;  %v1796_v57 = vsub.f32 %v1788_v50, %v1794_v56 }
 0x399   :  { %v1799_v58 = vmul.f32 1.442695, %v1796_v57 }
 0x39b   :  { %2404 = vpow2.f32 %v1799_v58 }
 0x3a4   :  { %v2403_v59 = vpop.eup %2402 }
 0x3a5   :  { %1801 = vadd.xlane.f32.xlu1 %v2403_v59 }
 0x3a8   :  { %v2405_v60 = vpop.eup %2404 }
 0x3a9   :  { %1803 = vadd.xlane.f32.xlu1 %v2405_v60 }
 0x42e   :  { %v1802_v61 = vpop.xlane.xlu1 %1801 }
 0x42f   :  { %2406 = vlog2.f32 %v1802_v61 }
 0x432   :  { %v1804_v55 = vpop.xlane.xlu1 %1803 }
 0x433   :  { %2408 = vlog2.f32 %v1804_v55 }
 0x43c   :  { %v2407_v62 = vpop.eup %2406 }
 0x43d   :  { %v1806_v63 = vmul.f32 0.6931472, %v2407_v62 }
 0x43f   :  { %v1809_v0 = vadd.f32 %v1806_v63, %v1792_v52 }
 0x440   :  { %v2409_v1 = vpop.eup %2408 }
 0x441   :  { %v1811_v2 = vsub.f32 %v1785_v47, %v1809_v0  ;;  %v1808_v3 = vmul.f32 0.6931472, %v2409_v1 }
 0x443   :  { %1813 = vst [vmem:[#allocation2] sm:$0xff] %v1811_v2  ;;  %v1810_v4 = vadd.f32 %v1808_v3, %v1794_v56 }
 0x445   :  { %v1812_v5 = vsub.f32 %v1788_v50, %v1810_v4 }
 0x447   :  { %1814 = vst [vmem:[#allocation2 + $0x8] sm:$0xff] %v1812_v5 }
 0x448   :  { %2421 = shalt.err (!%p2418_p4)
}
 0x449   :  { %s2436_s16 = smov 128   ;;  %s2437_s17 = smov 8  }
 0x44a   :  { %1826 = dma.vmem_to_hbm [thread:$0]  %s1821_s6, 256, %s3125_s7, [#allocation3], %s2436_s16, %s2436_s16, %s2437_s17  }
 0x44b   :  { %2430 = dma.done.wait [#allocation3], 256  }
 0x44c   :  { %2431 = vsyncadd [#allocation3], 4294967040 }
 0x44d   :  { %1830 = vsyncpa [#allocation3], 1 }

</bundles_post_ra>
